<compile_context>
chip_gen: v6e
topology: v6e:2x2x1
jax: 0.10.0
libtpu: 0.0.40
codegen_flags: <defaults>
</compile_context>

<pallas_src>
import math

import jax
import jax.numpy as jnp
from jax import lax
from jax.experimental import pallas as pl
from jax.experimental.pallas import tpu as pltpu


def _round_up(x, m):
    return (x + m - 1) // m * m


def _vmem_limit_bytes():
    """Chip-aware scoped-VMEM limit (leaves headroom for Mosaic scratch)."""
    try:
        cap = int(getattr(pltpu.get_tpu_info(), "vmem_capacity_bytes", 64 << 20))
    except Exception:
        cap = 64 << 20                       # conservative (v7x per-TC VMEM)
    # ~40 MiB on 64 MiB parts (v7x), ~80 MiB on 128 MiB parts (v5e/v6e).
    return min(int(cap * 5 // 8), 96 << 20)


def _pick_tiles(Np, S, in_channels, cin_pad, cpads, out_channels, budget):
    """Pick (G groups, St samples) per tile.

    Constraints (from the (8,128) BlockSpec rule):
      * G  divides Np and is a multiple of 8 (or G == Np)
      * St divides S  and is a multiple of 8 (or St == S)
    Objective: maximize rows = G*St (MXU M dim, fewer grid steps), prefer a
    larger St (fewer reduction steps), subject to the VMEM budget.
    """
    cmax = max(cpads)
    cout_pad = cpads[-1]
    in_lane_bytes = sum(_round_up(c, 128) * 4 for c in in_channels)

    def tile_bytes(g, st):
        rows = g * st
        b = 2 * rows * in_lane_bytes                   # 2x-buffered f32 inputs
        b += 2 * g * _round_up(out_channels, 128) * 4  # 2x-buffered f32 output
        b += rows * cin_pad * 4                        # pad scratch (f32)
        b += 2 * rows * cmax * 4 + rows * cmax * 2     # ~2 f32 + 1 bf16 interm.
        b += g * cout_pad * 4                          # running-max accumulator
        return b

    g_cands = sorted({g for g in range(1, Np + 1)
                      if Np % g == 0 and (g % 8 == 0 or g == Np)}, reverse=True)
    st_cands = sorted({st for st in range(1, S + 1)
                       if S % st == 0 and (st % 8 == 0 or st == S)}, reverse=True)

    best = None                                        # (rows, St, G)
    for st in st_cands:
        for g in g_cands:
            if tile_bytes(g, st) <= budget:
                cand = (g * st, st, g)
                if best is None or cand > best:
                    best = cand
    if best is not None:
        return best[2], best[1]
    # Fallback: smallest legal tile (rely on vmem_limit headroom).
    return min(g_cands), min(st_cands)


# ----------------------------------------------------------------------------
# Pallas kernel: shared MLP (1x1 conv + folded BN + ReLU)  ->  max over samples
# ----------------------------------------------------------------------------
def _make_mlp_max_kernel(num_layers, has_points, G, St, D, out_channels):
    rows = G * St

    def kernel(*refs):
        n_in = 1 + (1 if has_points else 0) + 2 * num_layers
        in_refs = refs[:n_in]
        out_ref = refs[n_in]
        xpad_ref = refs[n_in + 1]                      # [rows, cin_pad] f32
        acc_ref = refs[n_in + 2]                       # [G, cout_pad]   f32

        gx_ref = in_refs[0]
        pos = 1
        gp_ref = None
        if has_points:
            gp_ref = in_refs[pos]
            pos += 1
        params = in_refs[pos:]                         # (w0, b0, w1, b1, ...)

        s = pl.program_id(2)

        @pl.when(s == 0)
        def _():
            acc_ref[...] = jnp.full_like(acc_ref, -jnp.inf)

        # Assemble the lane-padded first-layer operand in VMEM; the HBM
        # streams stay at their true (unpadded) channel widths.
        xpad_ref[...] = jnp.zeros_like(xpad_ref)
        xpad_ref[:, 0:3] = gx_ref[0].reshape(rows, 3)
        if has_points:
            xpad_ref[:, 3:3 + D] = gp_ref[0].reshape(rows, D)

        h = xpad_ref[...].astype(jnp.bfloat16)
        for i in range(num_layers):
            w = params[2 * i][...]                     # [Ci_pad, Co_pad] bf16
            b = params[2 * i + 1][...]                 # [1, Co_pad]      f32
            h = jnp.dot(h, w, preferred_element_type=jnp.float32)   # MXU
            h = jnp.maximum(h + b, 0.0)                # bias + ReLU in f32
            if i + 1 < num_layers:
                h = h.astype(jnp.bfloat16)

        co = h.shape[-1]
        slab_max = jnp.max(h.reshape(G, St, co), axis=1)            # [G, co]
        acc_ref[...] = jnp.maximum(acc_ref[...], slab_max)

        @pl.when(s == pl.num_programs(2) - 1)
        def _():
            out_ref[0] = acc_ref[...][:, :out_channels].astype(out_ref.dtype)

    return kernel


def mlp_max_pallas(grouped_xyz, grouped_points, weights, biases, real_dims,
                   out_channels):
    """grouped_xyz: [B,Np,S,3] f32, grouped_points: [B,Np,S,D] f32 or None
    -> [B, Np, out_channels] f32."""
    B, Np, S, _ = grouped_xyz.shape
    has_points = grouped_points is not None
    D = grouped_points.shape[-1] if has_points else 0
    cin_pad = weights[0].shape[0]
    cpads = [w.shape[1] for w in weights]
    cout_pad = cpads[-1]

    vmem_limit = _vmem_limit_bytes()
    wbytes = sum(int(w.size) * 2 for w in weights) + \
        sum(int(b.size) * 4 for b in biases)
    budget = max(vmem_limit - 2 * wbytes - (4 << 20), 2 << 20)
    in_ch = [3, D] if has_points else [3]
    G, St = _pick_tiles(Np, S, in_ch, cin_pad, cpads, out_channels, budget)
    rows = G * St
    grid = (B, Np // G, S // St)

    kernel = _make_mlp_max_kernel(len(weights), has_points, G, St, D,
                                  out_channels)

    in_specs = [pl.BlockSpec((1, G, St, 3), lambda b, g, s: (b, g, s, 0))]
    args = [grouped_xyz]
    if has_points:
        in_specs.append(pl.BlockSpec((1, G, St, D), lambda b, g, s: (b, g, s, 0)))
        args.append(grouped_points)
    for w, bia in zip(weights, biases):
        in_specs.append(pl.BlockSpec(w.shape, lambda b, g, s: (0, 0)))
        in_specs.append(pl.BlockSpec(bia.shape, lambda b, g, s: (0, 0)))
        args += [w, bia]

    # Honest (unpadded) cost hints.
    flops = 2 * B * Np * S * sum(real_dims[i] * real_dims[i + 1]
                                 for i in range(len(real_dims) - 1))
    bytes_accessed = (grouped_xyz.size * 4
                      + (grouped_points.size * 4 if has_points else 0)
                      + wbytes + B * Np * out_channels * 4)

    out = pl.pallas_call(
        kernel,
        out_shape=jax.ShapeDtypeStruct((B, Np, out_channels), jnp.float32),
        grid=grid,
        in_specs=in_specs,
        out_specs=pl.BlockSpec((1, G, out_channels), lambda b, g, s: (b, g, 0)),
        scratch_shapes=[pltpu.VMEM((rows, cin_pad), jnp.float32),
                        pltpu.VMEM((G, cout_pad), jnp.float32)],
        compiler_params=pltpu.CompilerParams(
            dimension_semantics=("parallel", "parallel", "arbitrary"),
            vmem_limit_bytes=vmem_limit),
        cost_estimate=pl.CostEstimate(
            flops=int(flops), transcendentals=0,
            bytes_accessed=int(bytes_accessed)),
    )(*args)
    return out


# ----------------------------------------------------------------------------
# Plain-JAX glue: sampling / grouping (mirrors the PyTorch helpers)
# ----------------------------------------------------------------------------
def square_distance(src, dst):
    d = -2.0 * jnp.einsum("bnc,bmc->bnm", src, dst)
    d = d + jnp.sum(src ** 2, -1)[:, :, None]
    d = d + jnp.sum(dst ** 2, -1)[:, None, :]
    return d


def index_points(points, idx):
    B = points.shape[0]
    batch = jnp.arange(B).reshape((B,) + (1,) * (idx.ndim - 1))
    return points[batch, idx]


def farthest_point_sample(xyz, npoint):
    # TODO(synk): sequential FPS loop (argmax over N per step) stays in XLA;
    # it becomes the latency ceiling once the MLP kernel is fast.
    B, N, _ = xyz.shape

    def body(i, state):
        centroids, distance, farthest = state
        centroids = centroids.at[:, i].set(farthest)
        centroid = jnp.take_along_axis(
            xyz, farthest[:, None, None].astype(jnp.int32), axis=1)  # [B,1,3]
        dist = jnp.sum((xyz - centroid) ** 2, -1)                    # [B,N]
        distance = jnp.minimum(distance, dist)
        farthest = jnp.argmax(distance, axis=-1).astype(jnp.int32)
        return centroids, distance, farthest

    centroids = jnp.zeros((B, npoint), dtype=jnp.int32)
    distance = jnp.full((B, N), 1e10, dtype=jnp.float32)
    farthest = jnp.zeros((B,), dtype=jnp.int32)   # CUDA impl starts at idx 0
    centroids, _, _ = lax.fori_loop(0, npoint, body,
                                    (centroids, distance, farthest))
    return centroids


def ball_query(radius, nsample, xyz, new_xyz):
    B, N, _ = xyz.shape
    M = new_xyz.shape[1]
    sqrdists = square_distance(new_xyz, xyz)                       # [B,M,N]
    group_idx = jnp.broadcast_to(jnp.arange(N, dtype=jnp.int32), (B, M, N))
    group_idx = jnp.where(sqrdists > radius ** 2, N, group_idx)
    group_idx = jnp.sort(group_idx, axis=-1)[:, :, :nsample]
    group_first = jnp.broadcast_to(group_idx[:, :, :1], group_idx.shape)
    group_idx = jnp.where(group_idx == N, group_first, group_idx)
    return jnp.minimum(group_idx, N - 1)


def sample_and_group(npoint, radius, nsample, xyz, points):
    """Returns new_xyz [B,Np,3], centered grouped xyz [B,Np,S,3] and grouped
    point features [B,Np,S,D] (kept as separate streams; the concat / pad /
    bf16-cast now happen inside the Pallas kernel)."""
    fps_idx = farthest_point_sample(xyz, npoint)                   # [B,Np]
    new_xyz = index_points(xyz, fps_idx)                           # [B,Np,3]
    idx = ball_query(radius, nsample, xyz, new_xyz)                # [B,Np,S]
    grouped_xyz = index_points(xyz, idx) - new_xyz[:, :, None, :]  # [B,Np,S,3]
    grouped_points = index_points(points, idx) if points is not None else None
    return new_xyz, grouped_xyz, grouped_points


def sample_and_group_all(xyz, points):
    B, N, C = xyz.shape
    new_xyz = jnp.zeros((B, 1, C), dtype=xyz.dtype)
    grouped_xyz = xyz.reshape(B, 1, N, C)
    grouped_points = points.reshape(B, 1, N, -1) if points is not None else None
    return new_xyz, grouped_xyz, grouped_points


# ----------------------------------------------------------------------------
# Module wrapper (deterministic parameter init, BN folded into conv,
# output channels padded to the 128-lane width, weights stored in bf16)
# ----------------------------------------------------------------------------
class PointnetSAModulePallas:
    def __init__(self, npoint, radius, nsample, in_channel, mlp, group_all,
                 key):
        self.npoint = npoint
        self.radius = radius
        self.nsample = nsample
        self.group_all = group_all
        self.out_channels = mlp[-1]
        self.real_dims = [in_channel + 3] + list(mlp)
        self.weights = []   # bf16 [Cin_pad, Cout_pad] (conv weight * BN scale)
        self.biases = []    # f32  [1, Cout_pad]

        in_c = in_channel + 3
        in_pad = _round_up(in_c, 128)
        eps = 1e-5
        for out_c in mlp:
            out_pad = _round_up(out_c, 128)
            key, k1, k2, k3, k4, k5, k6 = jax.random.split(key, 7)
            w = jax.random.normal(k1, (out_c, in_c), jnp.float32) / math.sqrt(in_c)
            b = 0.05 * jax.random.normal(k2, (out_c,), jnp.float32)
            gamma = 1.0 + 0.1 * jax.random.normal(k3, (out_c,), jnp.float32)
            beta = 0.1 * jax.random.normal(k4, (out_c,), jnp.float32)
            mean = 0.05 * jax.random.normal(k5, (out_c,), jnp.float32)
            var = 1.0 + 0.1 * jax.random.uniform(k6, (out_c,), jnp.float32)
            scale = gamma / jnp.sqrt(var + eps)
            w_eff = (w * scale[:, None]).T                       # [in_c, out_c]
            b_eff = (b - mean) * scale + beta                    # [out_c]
            wp = jnp.zeros((in_pad, out_pad), jnp.float32)
            wp = wp.at[:in_c, :out_c].set(w_eff)
            bp = jnp.zeros((1, out_pad), jnp.float32)
            bp = bp.at[0, :out_c].set(b_eff)
            self.weights.append(wp.astype(jnp.bfloat16))
            self.biases.append(bp)
            in_c, in_pad = out_c, out_pad

    def _group(self, xyz, points):
        if self.group_all:
            return sample_and_group_all(xyz, points)
        return sample_and_group(
            self.npoint, self.radius, self.nsample, xyz, points)

    def __call__(self, xyz, points):
        new_xyz, grouped_xyz, grouped_points = self._group(xyz, points)
        feat = mlp_max_pallas(grouped_xyz, grouped_points, self.weights,
                              self.biases, self.real_dims, self.out_channels)
        return new_xyz, feat

    # pure-JAX reference in matching (bf16-MXU) precision, for checking
    def reference(self, xyz, points):
        new_xyz, gx, gp = self._group(xyz, points)
        B, Np, S, _ = gx.shape
        cin_pad = self.weights[0].shape[0]
        h = jnp.zeros((B, Np, S, cin_pad), jnp.float32)
        h = h.at[..., 0:3].set(gx)
        if gp is not None:
            D = gp.shape[-1]
            h = h.at[..., 3:3 + D].set(gp)
        h = h.astype(jnp.bfloat16)
        for i, (w, b) in enumerate(zip(self.weights, self.biases)):
            h = jnp.einsum("bpsc,cd->bpsd", h, w,
                           preferred_element_type=jnp.float32)
            h = jnp.maximum(h + b[0], 0.0)
            if i + 1 < len(self.weights):
                h = h.astype(jnp.bfloat16)
        return new_xyz, jnp.max(h, axis=2)[:, :, :self.out_channels]


# ----------------------------------------------------------------------------
if __name__ == "__main__":
    key = jax.random.PRNGKey(0)
    k_xyz, k_pts, k_par1, k_par2 = jax.random.split(key, 4)

    B, N, D = 2, 32, 4
    xyz = jax.random.uniform(k_xyz, (B, N, 3), jnp.float32)
    points = jax.random.normal(k_pts, (B, N, D), jnp.float32)

    # grouped SA module: npoint=8, radius=0.4, nsample=8, mlp=[16, 32]
    sa = PointnetSAModulePallas(npoint=8, radius=0.4, nsample=8,
                                in_channel=D, mlp=[16, 32],
                                group_all=False, key=k_par1)
    new_xyz, new_feat = sa(xyz, points)
    jax.block_until_ready(new_feat)
    _, ref_feat = sa.reference(xyz, points)
    assert new_xyz.shape == (B, 8, 3) and new_feat.shape == (B, 8, 32)
    assert jnp.allclose(new_feat, ref_feat, rtol=1e-2, atol=1e-2)

    # group_all SA module
    sa_all = PointnetSAModulePallas(npoint=1, radius=None, nsample=None,
                                    in_channel=D, mlp=[16, 32],
                                    group_all=True, key=k_par2)
    all_xyz, all_feat = sa_all(xyz, points)
    jax.block_until_ready(all_feat)
    _, ref_all = sa_all.reference(xyz, points)
    assert all_xyz.shape == (B, 1, 3) and all_feat.shape == (B, 1, 32)
    assert jnp.allclose(all_feat, ref_all, rtol=1e-2, atol=1e-2)

    print("KERNEL_OK")
</pallas_src>

<mosaic_0001>
module attributes {stable_mosaic.version = 11 : i64} {
  func.func @kernel(%arg0: i32, %arg1: i32, %arg2: i32, %arg3: memref<1x8x8x3xf32, #tpu.memory_space<vmem>>, %arg4: memref<1x8x8x4xf32, #tpu.memory_space<vmem>>, %arg5: memref<128x128xbf16, #tpu.memory_space<vmem>>, %arg6: memref<1x128xf32, #tpu.memory_space<vmem>>, %arg7: memref<128x128xbf16, #tpu.memory_space<vmem>>, %arg8: memref<1x128xf32, #tpu.memory_space<vmem>>, %arg9: memref<1x8x32xf32, #tpu.memory_space<vmem>>, %arg10: memref<64x128xf32, #tpu.memory_space<vmem>>, %arg11: memref<8x128xf32, #tpu.memory_space<vmem>>) attributes {dimension_semantics = [#tpu.dimension_semantics<parallel>, #tpu.dimension_semantics<parallel>, #tpu.dimension_semantics<arbitrary>], iteration_bounds = array<i64: 2, 1, 1>, scalar_prefetch = 0 : i64, scratch_operands = 2 : i64, tpu.core_type = #tpu.core_type<tc>, window_params = [{transform_indices = @transform_0, window_bounds = array<i64: 1, 8, 8, 3>}, {transform_indices = @transform_1, window_bounds = array<i64: 1, 8, 8, 4>}, {pipeline_mode = #tpu.pipeline_mode<synchronous>, transform_indices = @transform_2, window_bounds = array<i64: 128, 128>}, {pipeline_mode = #tpu.pipeline_mode<synchronous>, transform_indices = @transform_3, window_bounds = array<i64: 1, 128>}, {pipeline_mode = #tpu.pipeline_mode<synchronous>, transform_indices = @transform_4, window_bounds = array<i64: 128, 128>}, {pipeline_mode = #tpu.pipeline_mode<synchronous>, transform_indices = @transform_5, window_bounds = array<i64: 1, 128>}, {transform_indices = @transform_6, window_bounds = array<i64: 1, 8, 32>}]} {
    %c0_i32 = arith.constant 0 : i32
    %0 = arith.cmpi eq, %arg2, %c0_i32 : i32
    %1 = arith.extui %0 : i1 to i32
    %c0_i32_0 = arith.constant 0 : i32
    %2 = arith.cmpi ne, %1, %c0_i32_0 : i32
    scf.if %2 {
      %cst_34 = arith.constant 0xFF800000 : f32
      %38 = vector.broadcast %cst_34 : f32 to vector<8x128xf32>
      %c0_35 = arith.constant 0 : index
      %c0_36 = arith.constant 0 : index
      %39 = vector.load %arg11[%c0_35, %c0_36] : memref<8x128xf32, #tpu.memory_space<vmem>>, vector<8x128xf32>
      tpu.vector_store %arg11[%c0_35, %c0_36], %38 {strides = array<i32>} : memref<8x128xf32, #tpu.memory_space<vmem>>, vector<8x128xf32>,
    } else {
    }
    %cst = arith.constant 0.000000e+00 : f32
    %3 = vector.broadcast %cst : f32 to vector<64x128xf32>
    %c0 = arith.constant 0 : index
    %c0_1 = arith.constant 0 : index
    %4 = vector.load %arg10[%c0, %c0_1] : memref<64x128xf32, #tpu.memory_space<vmem>>, vector<64x128xf32>
    tpu.vector_store %arg10[%c0, %c0_1], %3 {strides = array<i32>} : memref<64x128xf32, #tpu.memory_space<vmem>>, vector<64x128xf32>,
    %c0_2 = arith.constant 0 : index
    %c0_3 = arith.constant 0 : index
    %c0_4 = arith.constant 0 : index
    %c0_5 = arith.constant 0 : index
    %5 = vector.load %arg3[%c0_2, %c0_3, %c0_4, %c0_5] : memref<1x8x8x3xf32, #tpu.memory_space<vmem>>, vector<1x8x8x3xf32>
    %6 = vector.shape_cast %5 : vector<1x8x8x3xf32> to vector<8x8x3xf32>
    %7 = vector.shape_cast %6 : vector<8x8x3xf32> to vector<64x3xf32>
    %c0_6 = arith.constant 0 : index
    %c0_7 = arith.constant 0 : index
    %8 = vector.load %arg10[%c0_6, %c0_7] : memref<64x128xf32, #tpu.memory_space<vmem>>, vector<64x3xf32>
    tpu.vector_store %arg10[%c0_6, %c0_7], %7 {strides = array<i32>} : memref<64x128xf32, #tpu.memory_space<vmem>>, vector<64x3xf32>,
    %c0_8 = arith.constant 0 : index
    %c0_9 = arith.constant 0 : index
    %c0_10 = arith.constant 0 : index
    %c0_11 = arith.constant 0 : index
    %9 = vector.load %arg4[%c0_8, %c0_9, %c0_10, %c0_11] : memref<1x8x8x4xf32, #tpu.memory_space<vmem>>, vector<1x8x8x4xf32>
    %10 = vector.shape_cast %9 : vector<1x8x8x4xf32> to vector<8x8x4xf32>
    %11 = vector.shape_cast %10 : vector<8x8x4xf32> to vector<64x4xf32>
    %c0_12 = arith.constant 0 : index
    %c3 = arith.constant 3 : index
    %12 = vector.load %arg10[%c0_12, %c3] : memref<64x128xf32, #tpu.memory_space<vmem>>, vector<64x4xf32>
    tpu.vector_store %arg10[%c0_12, %c3], %11 {strides = array<i32>} : memref<64x128xf32, #tpu.memory_space<vmem>>, vector<64x4xf32>,
    %c0_13 = arith.constant 0 : index
    %c0_14 = arith.constant 0 : index
    %13 = vector.load %arg10[%c0_13, %c0_14] : memref<64x128xf32, #tpu.memory_space<vmem>>, vector<64x128xf32>
    %14 = arith.truncf %13 : vector<64x128xf32> to vector<64x128xbf16>
    %c0_15 = arith.constant 0 : index
    %c0_16 = arith.constant 0 : index
    %15 = vector.load %arg5[%c0_15, %c0_16] : memref<128x128xbf16, #tpu.memory_space<vmem>>, vector<128x128xbf16>
    %c0_17 = arith.constant 0 : index
    %c0_18 = arith.constant 0 : index
    %16 = vector.load %arg6[%c0_17, %c0_18] : memref<1x128xf32, #tpu.memory_space<vmem>>, vector<1x128xf32>
    %cst_19 = arith.constant dense<0.000000e+00> : vector<64x128xf32>
    %17 = tpu.matmul %14, %15, %cst_19 {dimension_numbers = #tpu.dot_dimension_numbers<[1], [0], [0], [1], [0, 0, 1, 1], [], []>} : vector<64x128xbf16>, vector<128x128xbf16>, vector<64x128xf32> -> vector<64x128xf32>
    %18 = vector.broadcast %16 : vector<1x128xf32> to vector<64x128xf32>
    %19 = arith.addf %17, %18 : vector<64x128xf32>
    %cst_20 = arith.constant 0.000000e+00 : f32
    %20 = vector.broadcast %cst_20 : f32 to vector<64x128xf32>
    %21 = arith.maximumf %19, %20 : vector<64x128xf32>
    %22 = arith.truncf %21 : vector<64x128xf32> to vector<64x128xbf16>
    %c0_21 = arith.constant 0 : index
    %c0_22 = arith.constant 0 : index
    %23 = vector.load %arg7[%c0_21, %c0_22] : memref<128x128xbf16, #tpu.memory_space<vmem>>, vector<128x128xbf16>
    %c0_23 = arith.constant 0 : index
    %c0_24 = arith.constant 0 : index
    %24 = vector.load %arg8[%c0_23, %c0_24] : memref<1x128xf32, #tpu.memory_space<vmem>>, vector<1x128xf32>
    %cst_25 = arith.constant dense<0.000000e+00> : vector<64x128xf32>
    %25 = tpu.matmul %22, %23, %cst_25 {dimension_numbers = #tpu.dot_dimension_numbers<[1], [0], [0], [1], [0, 0, 1, 1], [], []>} : vector<64x128xbf16>, vector<128x128xbf16>, vector<64x128xf32> -> vector<64x128xf32>
    %26 = vector.broadcast %24 : vector<1x128xf32> to vector<64x128xf32>
    %27 = arith.addf %25, %26 : vector<64x128xf32>
    %cst_26 = arith.constant 0.000000e+00 : f32
    %28 = vector.broadcast %cst_26 : f32 to vector<64x128xf32>
    %29 = arith.maximumf %27, %28 : vector<64x128xf32>
    %30 = vector.shape_cast %29 : vector<64x128xf32> to vector<8x8x128xf32>
    %cst_27 = arith.constant dense<0xFF800000> : vector<8x128xf32>
    %31 = vector.multi_reduction <maximumf>, %30, %cst_27 [1] : vector<8x8x128xf32> to vector<8x128xf32>
    %c0_28 = arith.constant 0 : index
    %c0_29 = arith.constant 0 : index
    %32 = vector.load %arg11[%c0_28, %c0_29] : memref<8x128xf32, #tpu.memory_space<vmem>>, vector<8x128xf32>
    %33 = arith.maximumf %32, %31 : vector<8x128xf32>
    %c0_30 = arith.constant 0 : index
    %c0_31 = arith.constant 0 : index
    %34 = vector.load %arg11[%c0_30, %c0_31] : memref<8x128xf32, #tpu.memory_space<vmem>>, vector<8x128xf32>
    tpu.vector_store %arg11[%c0_30, %c0_31], %33 {strides = array<i32>} : memref<8x128xf32, #tpu.memory_space<vmem>>, vector<8x128xf32>,
    %c0_i32_32 = arith.constant 0 : i32
    %35 = arith.cmpi eq, %arg2, %c0_i32_32 : i32
    %36 = arith.extui %35 : i1 to i32
    %c0_i32_33 = arith.constant 0 : i32
    %37 = arith.cmpi ne, %36, %c0_i32_33 : i32
    scf.if %37 {
      %c0_34 = arith.constant 0 : index
      %c0_35 = arith.constant 0 : index
      %38 = vector.load %arg11[%c0_34, %c0_35] : memref<8x128xf32, #tpu.memory_space<vmem>>, vector<8x128xf32>
      %39 = vector.extract_strided_slice %38 {offsets = [0, 0], sizes = [8, 32], strides = [1, 1]} : vector<8x128xf32> to vector<8x32xf32>
      %c0_36 = arith.constant 0 : index
      %c0_37 = arith.constant 0 : index
      %c0_38 = arith.constant 0 : index
      %40 = vector.load %arg9[%c0_36, %c0_37, %c0_38] : memref<1x8x32xf32, #tpu.memory_space<vmem>>, vector<1x8x32xf32>
      %41 = vector.shape_cast %40 : vector<1x8x32xf32> to vector<8x32xf32>
      %42 = vector.shape_cast %39 : vector<8x32xf32> to vector<1x8x32xf32>
      tpu.vector_store %arg9[%c0_36, %c0_37, %c0_38], %42 {strides = array<i32>} : memref<1x8x32xf32, #tpu.memory_space<vmem>>, vector<1x8x32xf32>,
    } else {
    }
    return
  }
  func.func @transform_0(%arg0: i32, %arg1: i32, %arg2: i32) -> (i32, i32, i32, i32) {
    %c0_i32 = arith.constant 0 : i32
    %c0_i32_0 = arith.constant 0 : i32
    return %arg0, %arg1, %arg2, %c0_i32 : i32, i32, i32, i32
  }
  func.func @transform_1(%arg0: i32, %arg1: i32, %arg2: i32) -> (i32, i32, i32, i32) {
    %c0_i32 = arith.constant 0 : i32
    %c0_i32_0 = arith.constant 0 : i32
    return %arg0, %arg1, %arg2, %c0_i32 : i32, i32, i32, i32
  }
  func.func @transform_2(%arg0: i32, %arg1: i32, %arg2: i32) -> (i32, i32) {
    %c0_i32 = arith.constant 0 : i32
    %c0_i32_0 = arith.constant 0 : i32
    %c0_i32_1 = arith.constant 0 : i32
    return %c0_i32, %c0_i32_0 : i32, i32
  }
  func.func @transform_3(%arg0: i32, %arg1: i32, %arg2: i32) -> (i32, i32) {
    %c0_i32 = arith.constant 0 : i32
    %c0_i32_0 = arith.constant 0 : i32
    %c0_i32_1 = arith.constant 0 : i32
    return %c0_i32, %c0_i32_0 : i32, i32
  }
  func.func @transform_4(%arg0: i32, %arg1: i32, %arg2: i32) -> (i32, i32) {
    %c0_i32 = arith.constant 0 : i32
    %c0_i32_0 = arith.constant 0 : i32
    %c0_i32_1 = arith.constant 0 : i32
    return %c0_i32, %c0_i32_0 : i32, i32
  }
  func.func @transform_5(%arg0: i32, %arg1: i32, %arg2: i32) -> (i32, i32) {
    %c0_i32 = arith.constant 0 : i32
    %c0_i32_0 = arith.constant 0 : i32
    %c0_i32_1 = arith.constant 0 : i32
    return %c0_i32, %c0_i32_0 : i32, i32
  }
  func.func @transform_6(%arg0: i32, %arg1: i32, %arg2: i32) -> (i32, i32, i32) {
    %c0_i32 = arith.constant 0 : i32
    %c0_i32_0 = arith.constant 0 : i32
    return %arg0, %arg1, %c0_i32 : i32, i32, i32
  }
}

</mosaic_0001>

<bundles_post_ra>
// kernel: tpu_custom_call.1
= control target key start
LH: loop header
LB: loop body
LE: loop exit
PB: predicated region body
PF: predicated region fallthrough
CT: control target
= control target key end

     0   :  { %11 = vsyncpa [#allocation5], 0  ;;  %s1430_s0 = inlined_call_operand.vmem [shape: f32[2,8,8,3], index: 0, kind: input, shape index: {}]   ;;  %s1431_s1 = inlined_call_operand.vmem [shape: f32[2,8,8,4], index: 1, kind: input, shape index: {}]   ;;  %s1432_s2 = inlined_call_operand.vmem [shape: bf16[128,128], index: 2, kind: input, shape index: {}]   ;;  %s1433_s3 = inlined_call_operand.vmem [shape: f32[1,128], index: 3, kind: input, shape index: {}]   ;;  %s1434_s4 = inlined_call_operand.vmem [shape: bf16[128,128], index: 4, kind: input, shape index: {}]   ;;  %s1435_s5 = inlined_call_operand.vmem [shape: f32[1,128], index: 5, kind: input, shape index: {}]   ;;  %s1436_s6 = inlined_call_operand.hbm [shape: f32[2,8,32], index: 6, kind: output, shape index: {}]  }
   0x1   :  { %13 = vsyncpa [#allocation5 + $0x1], 0  ;;  %s1220_s21 = smov 0   ;;  %s1222_s22 = smov 0  }
   0x2   :  { %s1224_s23 = smov 0   ;;  %s1226_s24 = smov 0  }
   0x3   :  { %s1228_s25 = smov 0   ;;  %s1230_s26 = smov 0  }
   0x4 LB: > { %s925_s27 = sadd.s32 4294967295, %s1180_s26   ;;  %s926_s28 = sadd.s32 4294967294, %s1180_s26   ;;  %s1180_s26 = sphi %s1230_s26, %s19_s26   ;;  %s1176_s25 = sphi %s1228_s25, %s1443_s25   ;;  %s1172_s24 = sphi %s1226_s24, %s1442_s24   ;;  %s1168_s23 = sphi %s1224_s23, %s1441_s23   ;;  %s1164_s22 = sphi %s1222_s22, %s1440_s22   ;;  %s1160_s21 = sphi %s1220_s21, %s1439_s21  }
   0x5   : > { %s38_s29 = sadd.s32 1, %s1176_s25  ;;  %s191_s30 = sadd.s32 1, %s1168_s23 }
   0x6   : > { %p40_p0 = scmp.ge.s32.totalorder %s38_s29, 2  ;;  %p201_p1 = scmp.ne.s32.totalorder %s1168_s23, %s1164_s22 }
   0x7   : > { %p202_p2 = scmp.eq.s32.totalorder %s925_s27, 1  ;;  %p207_p3 = scmp.ne.s32.totalorder %s1164_s22, %s1160_s21 }
   0x8   : > { %s1445_s29 = smov (%p40_p0, %s38_s29), 0  ;;  %p208_p5 = scmp.eq.s32.totalorder %s926_s28, 1 }
   0x9   : > { %p1260_p4 = por %p202_p2, %p201_p1  ;;  %s186_s8 = ssub.s32 %s1176_s25, %s1445_s29 }
   0xa   : > { %p929_p6 = scmp.ge.s32.totalorder %s1180_s26, 1  ;;  %p189_p7 = scmp.eq.s32.totalorder %s186_s8, 0 }
   0xb   : > { %p1267_p8 = por %p208_p5, %p207_p3  ;;  %p270_p9 = scmp.lt.s32.totalorder %s1180_s26, 3 }
   0xc   : > { %s1273_s10 = scalar_select %p189_p7, %s1168_s23, %s191_s30  }
   0xd   : > { %p271_p10 = pnand %p929_p6, %p270_p9 }
   0xe   : > { %p320_p11 = scmp.lt.s32.totalorder (!%p271_p10), %s1172_s24, 1  ;;  %s1183_s11 = smov (!%p271_p10), 3  }
   0xf   : > { %274 = sbr.rel (%p271_p10) target bundleno = 600 (0x258), region = 44  ;;  %s1184_s30 = smov (!%p271_p10), [#allocation4]  }
  0x14   : > { %v1088_v0 = vld [vmem:[%s1432_s2 + $0x38] sm:$0xff]   ;;  %s321_s13 = scalar_select %p320_p11, %s1172_s24, 1  ;;  %v1089_v1 = vld [vmem:[%s1432_s2 + $0x30] sm:$0xff]   ;;  %v1182_v2 = vmov 0.0   ;;  %v1090_v3 = vld [vmem:[%s1432_s2 + $0x28] sm:$0xff]   ;;  %vm367_vm0 = vcmask 23552  }
  0x15   : > { %353 = vst [vmem:[#allocation2 + $0x10] sm:$0xff] %v1182_v2  ;;  %351 = vst [vmem:[#allocation2] sm:$0xff] %v1182_v2  ;;  %983 = vmatprep.subr.bf16.mxu0 %v1088_v0  ;;  %v1091_v8 = vld [vmem:[%s1432_s2 + $0x20] sm:$0xff]   ;;  %v1092_v17 = vld [vmem:[%s1432_s2 + $0x18] sm:$0xff]   ;;  %vm416_vm1 = vcmask 56344   ;;  %vm786_vm2 = vcmask 1041409  }
  0x16   : > { %352 = vst [vmem:[#allocation2 + $0x8] sm:$0xff] %v1182_v2  ;;  %354 = vst [vmem:[#allocation2 + $0x18] sm:$0xff] %v1182_v2  ;;  %s957_s16 = sshll.u32 %s321_s13, 6  ;;  %984 = vmatpush3.bf16.msra.mxu0 %v1088_v0  ;;  %v1093_v22 = vld [vmem:[%s1432_s2 + $0x10] sm:$0xff]   ;;  %v1096_v23 = vld [vmem:[%s1434_s4 + $0x38] sm:$0xff]   ;;  %vm788_vm3 = vcmask 1042434  }
  0x17   : > { %355 = vst [vmem:[#allocation2 + $0x20] sm:$0xff] %v1182_v2  ;;  %356 = vst [vmem:[#allocation2 + $0x28] sm:$0xff] %v1182_v2  ;;  %s1286_s19 = scalar_lea.vmem %s1431_s1, %s957_s16  ;;  %985 = vmatprep.subr.bf16.mxu0 %v1089_v1  ;;  %s1295_s8 = scalar_lea.vmem %s1430_s0, %s957_s16  ;;  %v1097_v24 = vld [vmem:[%s1434_s4 + $0x30] sm:$0xff]   ;;  %v1094_v25 = vld [vmem:[%s1432_s2 + $0x8] sm:$0xff]   ;;  %1007 = vmatprep.subr.bf16.mxu1 %v1096_v23  ;;  %vm790_vm4 = vcmask 1043459   ;;  %vm792_vm5 = vcmask 1044484  }
  0x18   : > { %357 = vst [vmem:[#allocation2 + $0x30] sm:$0xff] %v1182_v2  ;;  %358 = vst [vmem:[#allocation2 + $0x38] sm:$0xff] %v1182_v2  ;;  %v378_v4 = vld [vmem:[%s1286_s19 + $0x10] sm:$0xff]  ;;  %v376_v5 = vld [vmem:[%s1286_s19] sm:$0xff]  ;;  %1008 = vmatpush3.bf16.msra.mxu1 %v1096_v23  ;;  %vm794_vm6 = vcmask 1045509   ;;  %vm796_vm7 = vcmask 1046534  }
  0x19   : > { %396 = vrot.lane.b32.xlu1 %v378_v4, %s1183_s11  ;;  %392 = vrot.lane.b32.xlu0 %v376_v5, %s1183_s11  ;;  %v379_v6 = vld [vmem:[%s1286_s19 + $0x18] sm:$0xff]  ;;  %v377_v7 = vld [vmem:[%s1286_s19 + $0x8] sm:$0xff]  ;;  %s954_s16 = sshll.u32 %s1172_s24, 7  ;;  %vm798_vm8 = vcmask 1047559   ;;  %vm807_vm9 = vcmask 261120  }
  0x1a   : > { %986 = vmatpush3.bf16.msra.mxu0 %v1089_v1  ;;  %v361_v9 = vld [vmem:[%s1295_s8 + $0x10] sm:$0xff]  ;;  %v359_v10 = vld [vmem:[%s1295_s8] sm:$0xff]  ;;  %v381_v11 = vld [vmem:[%s1286_s19 + $0x28] sm:$0xff]  ;;  %1009 = vmatprep.subr.bf16.mxu1 %v1097_v24  ;;  %s1388_s27 = scalar_lea.hbm %s1436_s6, %s954_s16 }
  0x1b   : > { %987 = vmatprep.subr.bf16.mxu0 %v1090_v3  ;;  %370 = vst.msk [vmem:[#allocation2 + $0x10] sm:$0xff] %vm367_vm0, %v361_v9  ;;  %368 = vst.msk [vmem:[#allocation2] sm:$0xff] %vm367_vm0, %v359_v10  ;;  %v362_v12 = vld [vmem:[%s1295_s8 + $0x18] sm:$0xff]  ;;  %v360_v13 = vld [vmem:[%s1295_s8 + $0x8] sm:$0xff] }
  0x1c   : > { %v380_v14 = vld [vmem:[%s1286_s19 + $0x20] sm:$0xff]  ;;  %371 = vst.msk [vmem:[#allocation2 + $0x18] sm:$0xff] %vm367_vm0, %v362_v12  ;;  %369 = vst.msk [vmem:[#allocation2 + $0x8] sm:$0xff] %vm367_vm0, %v360_v13  ;;  %v364_v15 = vld [vmem:[%s1295_s8 + $0x28] sm:$0xff]  ;;  %1010 = vmatpush3.bf16.msra.mxu1 %v1097_v24 }
  0x1d   : > { %398 = vrot.lane.b32.xlu1 %v379_v6, %s1183_s11  ;;  %394 = vrot.lane.b32.xlu0 %v377_v7, %s1183_s11  ;;  %v363_v16 = vld [vmem:[%s1295_s8 + $0x20] sm:$0xff]  ;;  %373 = vst.msk [vmem:[#allocation2 + $0x28] sm:$0xff] %vm367_vm0, %v364_v15  ;;  %v366_v18 = vld [vmem:[%s1295_s8 + $0x38] sm:$0xff] }
  0x1e   : > { %988 = vmatpush3.bf16.msra.mxu0 %v1090_v3  ;;  %372 = vst.msk [vmem:[#allocation2 + $0x20] sm:$0xff] %vm367_vm0, %v363_v16  ;;  %v383_v19 = vld [vmem:[%s1286_s19 + $0x38] sm:$0xff]  ;;  %v382_v20 = vld [vmem:[%s1286_s19 + $0x30] sm:$0xff]  ;;  %375 = vst.msk [vmem:[#allocation2 + $0x38] sm:$0xff] %vm367_vm0, %v366_v18 }
  0x1f   : > { %989 = vmatprep.subr.bf16.mxu0 %v1091_v8  ;;  %v365_v21 = vld [vmem:[%s1295_s8 + $0x30] sm:$0xff]  ;;  %v1098_v26 = vld [vmem:[%s1434_s4 + $0x28] sm:$0xff]   ;;  %v1095_v27 = vld [vmem:[%s1432_s2] sm:$0xff]   ;;  %s1108_s8 = sshll.u32 %s1184_s30, 4  ;;  %s1109_s8 = int_to_ptr.vmem [resolvable:$false] %s1108_s8 }
  0x20   : > { %374 = vst.msk [vmem:[#allocation2 + $0x30] sm:$0xff] %vm367_vm0, %v365_v21  ;;  %1011 = vmatprep.subr.bf16.mxu1 %v1098_v26  ;;  %v1099_v28 = vld [vmem:[%s1434_s4 + $0x20] sm:$0xff]   ;;  %v1100_v29 = vld [vmem:[%s1434_s4 + $0x18] sm:$0xff]   ;;  %v1101_v50 = vld [vmem:[%s1434_s4 + $0x10] sm:$0xff]   ;;  %s1110_s12 = scalar_lea.vmem %s1109_s8, 256 }
  0x21   : > { %402 = vrot.lane.b32.xlu1 %v381_v11, %s1183_s11  ;;  %400 = vrot.lane.b32.xlu0 %v380_v14, %s1183_s11  ;;  %v1102_v51 = vld [vmem:[%s1434_s4 + $0x8] sm:$0xff]   ;;  %v1103_v52 = vld [vmem:[%s1434_s4] sm:$0xff]  }
  0x22   : > { %990 = vmatpush3.bf16.msra.mxu0 %v1091_v8  ;;  %1012 = vmatpush3.bf16.msra.mxu1 %v1098_v26  ;;  %v935_v55 = vld [vmem:[%s1433_s3] ss:$0 sm:$0xff] }
  0x23   : > { %991 = vmatprep.subr.bf16.mxu0 %v1092_v17  ;;  %1013 = vmatprep.subr.bf16.mxu1 %v1099_v28  ;;  %v944_v18 = vld [vmem:[%s1435_s5] ss:$0 sm:$0xff] }
  0x25   : > { %406 = vrot.lane.b32.xlu1 %v383_v19, %s1183_s11  ;;  %404 = vrot.lane.b32.xlu0 %v382_v20, %s1183_s11  ;;  %s316_s11 = sand.u32 1, %s1164_s22  }
  0x26   : > { %992 = vmatpush3.bf16.msra.mxu0 %v1092_v17  ;;  %1014 = vmatpush3.bf16.msra.mxu1 %v1099_v28  ;;  %s930_s15 = sshll.u32 %s316_s11, 3  ;;  %s810_s24 = scalar_lea.sflag [#allocation5], %s316_s11 }
  0x27   : > { %993 = vmatprep.subr.bf16.mxu0 %v1093_v22  ;;  %1015 = vmatprep.subr.bf16.mxu1 %v1100_v29  ;;  %s318_s17 = scalar_lea.vmem [#allocation4], %s930_s15 }
  0x28   : > { %s824_s18 = sshll.u32 %s318_s17, 4  ;;  %s825_s18 = int_to_ptr.vmem [resolvable:$true] %s824_s18 }
  0x29   : > { %s1104_s28 = scalar_lea.vmem %s825_s18, 128  ;;  %p1111_p1 = scmp.lt.s32.totalorder %s825_s18, %s1109_s8 }
  0x2a   : > { %994 = vmatpush3.bf16.msra.mxu0 %v1093_v22  ;;  %1016 = vmatpush3.bf16.msra.mxu1 %v1100_v29  ;;  %p1105_p12 = scmp.ne.s32.totalorder %s825_s18, %s1104_s28  ;;  %p1112_p2 = scmp.lt.s32.totalorder %s1110_s12, %s1104_s28 }
  0x2b   : > { %995 = vmatprep.subr.bf16.mxu0 %v1094_v25  ;;  %1017 = vmatprep.subr.bf16.mxu1 %v1101_v50 }
  0x2c   : > { %p1106_p13 = pnand %p1105_p12, %p1260_p4  ;;  %p1113_p3 = por %p1112_p2, %p1111_p1 }
  0x2e   : > { %996 = vmatpush3.bf16.msra.mxu0 %v1094_v25  ;;  %1018 = vmatpush3.bf16.msra.mxu1 %v1101_v50  ;;  %p1107_p0 = pneg %p1106_p13 }
  0x2f   : > { %997 = vmatprep.subr.bf16.mxu0 %v1095_v27  ;;  %1019 = vmatprep.subr.bf16.mxu1 %v1102_v51 }
  0x30   : > { %p1114_p5 = pnand %p1113_p3, %p1107_p0 }
  0x32   : > { %998 = vmatpush3.bf16.msra.mxu0 %v1095_v27  ;;  %1020 = vmatpush3.bf16.msra.mxu1 %v1102_v51 }
  0x33   : > { %1021 = vmatprep.subr.bf16.mxu1 %v1103_v52 }
  0x36   : > { %1022 = vmatpush3.bf16.msra.mxu1 %v1103_v52 }
  0x8b   : > { %v397_v30 = vpop.permute.xlu1 %396  ;;  %v393_v31 = vpop.permute.xlu0 %392 }
  0x8c   : > { %419 = vst.msk [vmem:[#allocation2 + $0x10] sm:$0xff] %vm416_vm1, %v397_v30  ;;  %417 = vst.msk [vmem:[#allocation2] sm:$0xff] %vm416_vm1, %v393_v31 }
  0x8f   : > { %v399_v32 = vpop.permute.xlu1 %398  ;;  %v395_v33 = vpop.permute.xlu0 %394 }
  0x90   : > { %420 = vst.msk [vmem:[#allocation2 + $0x18] sm:$0xff] %vm416_vm1, %v399_v32  ;;  %418 = vst.msk [vmem:[#allocation2 + $0x8] sm:$0xff] %vm416_vm1, %v395_v33 }
  0x93   : > { %v403_v34 = vpop.permute.xlu1 %402  ;;  %v401_v35 = vpop.permute.xlu0 %400  ;;  %v425_v36 = vld [vmem:[#allocation2] sm:$0xff]  ;;  %v427_v40 = vld [vmem:[#allocation2 + $0x10] sm:$0xff] }
  0x94   : > { %422 = vst.msk [vmem:[#allocation2 + $0x28] sm:$0xff] %vm416_vm1, %v403_v34  ;;  %421 = vst.msk [vmem:[#allocation2 + $0x20] sm:$0xff] %vm416_vm1, %v401_v35 }
  0x97   : > { %v407_v37 = vpop.permute.xlu1 %406  ;;  %v405_v38 = vpop.permute.xlu0 %404  ;;  %v426_v39 = vld [vmem:[#allocation2 + $0x8] sm:$0xff]  ;;  %v428_v41 = vld [vmem:[#allocation2 + $0x18] sm:$0xff] }
  0x98   : > { %424 = vst.msk [vmem:[#allocation2 + $0x38] sm:$0xff] %vm416_vm1, %v407_v37  ;;  %423 = vst.msk [vmem:[#allocation2 + $0x30] sm:$0xff] %vm416_vm1, %v405_v38  ;;  %v433_v42 = vpack.c.bf16 %v426_v39, %v425_v36  ;;  %v434_v43 = vpack.c.bf16 %v428_v41, %v427_v40 }
  0x9a   : > { %999 = vmatprep.mubr.bf16.mxu0 %v433_v42 }
  0x9b   : > { %1000 = vmatmul.mubr.bf16.vlgmr.msra.gmra.mxu0 %v434_v43  ;;  %v429_v44 = vld [vmem:[#allocation2 + $0x20] sm:$0xff]  ;;  %v430_v45 = vld [vmem:[#allocation2 + $0x28] sm:$0xff] }
  0x9c   : > { %v435_v46 = vpack.c.bf16 %v430_v45, %v429_v44 }
  0x9e   : > { %1003 = vmatprep.mubr.bf16.mxu0 %v435_v46 }
  0x9f   : > { %v431_v47 = vld [vmem:[#allocation2 + $0x30] sm:$0xff]  ;;  %v432_v48 = vld [vmem:[#allocation2 + $0x38] sm:$0xff] }
  0xa0   : > { %v436_v49 = vpack.c.bf16 %v432_v48, %v431_v47 }
  0xa3   : > { %1004 = vmatmul.mubr.bf16.gmra.mxu0 %v436_v49 }
 0x15b   : > { %v1001_v53 = vpop.f32.mrf.mxu0 }
 0x15c   : > { %v551_v59 = vadd.f32 %v1001_v53, %v935_v55 }
 0x15d   : > { %v542_v54 = vpop.f32.mrf.mxu0 }
 0x15e   : > { %v543_v57 = vadd.f32 %v935_v55, %v542_v54  ;;  %v575_v2 = vmax.f32 %v551_v59, 0.0 }
 0x15f   : > { %v1002_v56 = vpop.f32.mrf.mxu0 }
 0x160   : > { %v554_v58 = vadd.f32 %v1002_v56, %v935_v55  ;;  %v573_v0 = vmax.f32 %v543_v57, 0.0 }
 0x161   : > { %v545_v60 = vpop.f32.mrf.mxu0 }
 0x162   : > { %v546_v61 = vadd.f32 %v935_v55, %v545_v60  ;;  %v576_v62 = vmax.f32 %v554_v58, 0.0 }
 0x163   : > { %v1005_v63 = vpop.f32.mrf.mxu0 }
 0x164   : > { %v574_v1 = vmax.f32 %v546_v61, 0.0  ;;  %v582_v5 = vpack.c.bf16 %v576_v62, %v575_v2  ;;  %v567_v9 = vadd.f32 %v1005_v63, %v935_v55 }
 0x165   : > { %v558_v3 = vpop.f32.mrf.mxu0 }
 0x166   : > { %v581_v4 = vpack.c.bf16 %v574_v1, %v573_v0  ;;  %v559_v7 = vadd.f32 %v935_v55, %v558_v3  ;;  %v579_v15 = vmax.f32 %v567_v9, 0.0 }
 0x167   : > { %v1006_v6 = vpop.f32.mrf.mxu0 }
 0x168   : > { %v570_v8 = vadd.f32 %v1006_v6, %v935_v55  ;;  %1023 = vmatprep.mubr.bf16.mxu1 %v581_v4  ;;  %v577_v13 = vmax.f32 %v559_v7, 0.0 }
 0x169   : > { %v561_v10 = vpop.f32.mrf.mxu0  ;;  %1024 = vmatmul.mubr.bf16.vlgmr.msra.gmra.mxu1 %v582_v5 }
 0x16a   : > { %v562_v11 = vadd.f32 %v935_v55, %v561_v10  ;;  %v580_v12 = vmax.f32 %v570_v8, 0.0 }
 0x16c   : > { %v578_v14 = vmax.f32 %v562_v11, 0.0  ;;  %v584_v17 = vpack.c.bf16 %v580_v12, %v579_v15 }
 0x16e   : > { %v583_v16 = vpack.c.bf16 %v578_v14, %v577_v13 }
 0x170   : > { %1027 = vmatprep.mubr.bf16.mxu1 %v583_v16 }
 0x171   : > { %1028 = vmatmul.mubr.bf16.gmra.mxu1 %v584_v17 }
 0x229   : > { %v1025_v19 = vpop.f32.mrf.mxu1 }
 0x22a   : > { %v699_v20 = vadd.f32 %v1025_v19, %v944_v18 }
 0x22b   : > { %v690_v21 = vpop.f32.mrf.mxu1 }
 0x22c   : > { %v723_v22 = vmax.f32 %v699_v20, 0.0  ;;  %v691_v23 = vadd.f32 %v944_v18, %v690_v21 }
 0x22d   : > { %v1026_v24 = vpop.f32.mrf.mxu1 }
 0x22e   : > { %v741_v25 = vrot.slane %v723_v22, 4  ;;  %v721_v26 = vmax.f32 %v691_v23, 0.0  ;;  %v702_v27 = vadd.f32 %v1026_v24, %v944_v18 }
 0x22f   : > { %v693_v28 = vpop.f32.mrf.mxu1 }
 0x230   : > { %v742_v29 = vmax.f32 %v723_v22, %v741_v25  ;;  %v729_v30 = vrot.slane %v721_v26, 4  ;;  %v724_v31 = vmax.f32 %v702_v27, 0.0  ;;  %v694_v32 = vadd.f32 %v944_v18, %v693_v28 }
 0x231   : > { %v1029_v33 = vpop.f32.mrf.mxu1 }
 0x232   : > { %v730_v34 = vmax.f32 %v721_v26, %v729_v30  ;;  %v747_v35 = vrot.slane %v724_v31, 4  ;;  %v722_v36 = vmax.f32 %v694_v32, 0.0  ;;  %v715_v37 = vadd.f32 %v1029_v33, %v944_v18 }
 0x233   : > { %v706_v38 = vpop.f32.mrf.mxu1  ;;  %v743_v39 = vrot.slane %v742_v29, 2 }
 0x234   : > { %v731_v40 = vrot.slane %v730_v34, 2  ;;  %v748_v41 = vmax.f32 %v724_v31, %v747_v35  ;;  %v735_v42 = vrot.slane %v722_v36, 4  ;;  %v727_v43 = vmax.f32 %v715_v37, 0.0 }
 0x235   : > { %v707_v44 = vadd.f32 %v944_v18, %v706_v38  ;;  %v1030_v45 = vpop.f32.mrf.mxu1  ;;  %v744_v52 = vmax.f32 %v742_v29, %v743_v39 }
 0x236   : > { %v732_v46 = vmax.f32 %v730_v34, %v731_v40  ;;  %v736_v47 = vmax.f32 %v722_v36, %v735_v42  ;;  %v765_v48 = vrot.slane %v727_v43, 4  ;;  %v718_v50 = vadd.f32 %v1030_v45, %v944_v18 }
 0x237   : > { %v725_v49 = vmax.f32 %v707_v44, 0.0  ;;  %v709_v51 = vpop.f32.mrf.mxu1  ;;  %v749_v53 = vrot.slane %v748_v41, 2  ;;  %v745_v0 = vrot.slane %v744_v52, 1 }
 0x238   : > { %v737_v54 = vrot.slane %v736_v47, 2  ;;  %v766_v55 = vmax.f32 %v727_v43, %v765_v48  ;;  %v728_v57 = vmax.f32 %v718_v50, 0.0  ;;  %v710_v58 = vadd.f32 %v944_v18, %v709_v51 }
 0x239   : > { %v753_v56 = vrot.slane %v725_v49, 4  ;;  %v733_v59 = vrot.slane %v732_v46, 1  ;;  %v750_v1 = vmax.f32 %v748_v41, %v749_v53  ;;  %v746_v14 = vmax.f32 %v744_v52, %v745_v0 }
 0x23a   : > { %v738_v60 = vmax.f32 %v736_v47, %v737_v54  ;;  %v771_v62 = vrot.slane %v728_v57, 4  ;;  %v726_v63 = vmax.f32 %v710_v58, 0.0  ;;  %v767_v3 = vrot.slane %v766_v55, 2 }
 0x23b   : > { %v754_v61 = vmax.f32 %v725_v49, %v753_v56  ;;  %v734_v7 = vmax.f32 %v732_v46, %v733_v59  ;;  %v751_v12 = vrot.slane %v750_v1, 1 }
 0x23c   : > { %v739_v2 = vrot.slane %v738_v60, 1  ;;  %v772_v5 = vmax.f32 %v728_v57, %v771_v62  ;;  %v759_v6 = vrot.slane %v726_v63, 4  ;;  %v768_v15 = vmax.f32 %v766_v55, %v767_v3 }
 0x23d   : > { %v755_v4 = vrot.slane %v754_v61, 2  ;;  %v752_v20 = vmax.f32 %v750_v1, %v751_v12 }
 0x23e   : > { %v740_v8 = vmax.f32 %v738_v60, %v739_v2  ;;  %v773_v10 = vrot.slane %v772_v5, 2  ;;  %v760_v11 = vmax.f32 %v726_v63, %v759_v6  ;;  %v769_v22 = vrot.slane %v768_v15, 1 }
 0x23f   : > { %v756_v9 = vmax.f32 %v754_v61, %v755_v4 }
 0x240   : > { %v787_v13 = vsel %vm786_vm2, %v740_v8, %v734_v7  ;;  %v774_v17 = vmax.f32 %v772_v5, %v773_v10  ;;  %v761_v18 = vrot.slane %v760_v11, 2  ;;  %v770_v28 = vmax.f32 %v768_v15, %v769_v22 }
 0x241   : > { %v757_v16 = vrot.slane %v756_v9, 1  ;;  %v789_v19 = vsel %vm788_vm3, %v746_v14, %v787_v13 }
 0x242   : > { %v762_v21 = vmax.f32 %v760_v11, %v761_v18  ;;  %v791_v24 = vsel %vm790_vm4, %v752_v20, %v789_v19  ;;  %v775_v25 = vrot.slane %v774_v17, 1 }
 0x243   : > { %v758_v23 = vmax.f32 %v756_v9, %v757_v16 }
 0x244   : > { %v763_v26 = vrot.slane %v762_v21, 1  ;;  %v776_v30 = vmax.f32 %v774_v17, %v775_v25 }
 0x245   : > { %v793_v29 = vsel %vm792_vm5, %v758_v23, %v791_v24 }
 0x246   : > { %v764_v27 = vmax.f32 %v762_v21, %v763_v26 }
 0x248   : > { %v795_v31 = vsel %vm794_vm6, %v764_v27, %v793_v29 }
 0x249   : > { %v797_v32 = vsel %vm796_vm7, %v770_v28, %v795_v31 }
 0x24a   : > { %v799_v33 = vsel %vm798_vm8, %v776_v30, %v797_v32 }
 0x24b   : > { %808 = vst.msk [vmem:[%s318_s17] sm:$0xff] %vm807_vm9, %v799_v33 }
 0x24c   : > { %1117 = shalt.err (!%p1114_p5)
}
 0x24d   : > { %s1118_s13 = scalar_lea.hbm %s1388_s27, 128  ;;  %s1122_s15 = scalar_lea.hbm %s1436_s6, 256 }
 0x24e   : > { %p1119_p6 = scmp.ne.s32.totalorder %s1388_s27, %s1118_s13  ;;  %p1123_p10 = scmp.lt.s32.totalorder %s1388_s27, %s1436_s6 }
 0x24f   : > { %p1124_p11 = scmp.lt.s32.totalorder %s1122_s15, %s1118_s13 }
 0x250   : > { %p1120_p7 = pnand %p1119_p6, %p1260_p4 }
 0x251   : > { %p1125_p12 = por %p1124_p11, %p1123_p10 }
 0x252   : > { %p1121_p9 = pneg %p1120_p7 }
 0x254   : > { %p1126_p13 = pnand %p1125_p12, %p1121_p9 }
 0x256   : > { %1129 = shalt.err (!%p1126_p13)
}
 0x257   : > { %1031 = dma.vmem_to_hbm [thread:$0]  (%p1260_p4), %s825_s18, 128, %s1388_s27, %s810_s24  }
 0x258 PF: > { %p1037_p0 = scmp.ge.s32.totalorder %s1180_s26, 2  ;;  %s836_s20 = sand.u32 1, %s1160_s21  }
 0x259   : > { %s837_s19 = scalar_lea.sflag [#allocation5], %s836_s20 }
 0x25a   : > { %p1034_p1 = pnand %p1037_p0, %p1267_p8 }
 0x25c   : > { %p1035_p2 = pneg %p1034_p1 }
 0x25e   : > { %1155 = dma.done.wait (%p1035_p2), %s837_s19, 128  }
 0x25f   : > { %1157 = vsyncadd (%p1035_p2), %s837_s19, 4294967168  ;;  %s19_s26 = sadd.s32 1, %s1180_s26   ;;  %s1439_s21 = smov %s1164_s22 }
 0x260   : > { %p16_p3 = scmp.ge.s32.totalorder %s19_s26, 4   ;;  %s1440_s22 = smov %s1168_s23 }
 0x261   : > { %s1441_s23 = smov %s1273_s10  ;;  %s1442_s24 = smov %s1176_s25 }
 0x262   : > { %s1443_s25 = smov %s1445_s29  ;;  %18 = sbr.rel (!%p16_p3) target bundleno = 4 (0x4), region = 90 }
 0x267   :  { %842 = vsyncpa [#allocation5], 1 }
 0x268   :  { %844 = vsyncpa [#allocation5 + $0x1], 1 }

</bundles_post_ra>
